<compile_context>
chip_gen: v6e
topology: v6e:2x2x1
jax: 0.10.0
libtpu: 0.0.40
codegen_flags: <defaults>
</compile_context>

<pallas_src>
import math

import jax
import jax.numpy as jnp
from jax import lax
from jax.experimental import pallas as pl

D_MODEL = 32
N_HEADS = 4
D_K = D_MODEL // N_HEADS


# ------------------------------ Pallas kernel -------------------------------

def _mha_kernel(xq_ref, xk_ref, xv_ref, amask_ref, wqkv_ref, bqkv_ref,
                wo_ref, bo_ref, o_ref):
    """Fused MHA: projections + per-head attention + output projection."""
    B, S, _ = amask_ref.shape               # static shapes
    scale = 1.0 / math.sqrt(D_K)

    # Q/K/V projections over all B*S rows at once (nn.Linear, weights [in,out]).
    q = jnp.dot(xq_ref[...], wqkv_ref[0], preferred_element_type=jnp.float32) + bqkv_ref[0]
    k = jnp.dot(xk_ref[...], wqkv_ref[1], preferred_element_type=jnp.float32) + bqkv_ref[1]
    v = jnp.dot(xv_ref[...], wqkv_ref[2], preferred_element_type=jnp.float32) + bqkv_ref[2]

    bo_row = bo_ref[...]                     # (1, D), hoisted out of the loops

    for b in range(B):                       # static unroll over batch
        r0 = b * S
        amask_b = amask_ref[b]               # (S, S) additive mask, no in-loop broadcast
        out_b = None
        for h in range(N_HEADS):             # static unroll over heads
            lo = h * D_K
            qh = q[r0:r0 + S, lo:lo + D_K]   # (S, Dk)
            kh = k[r0:r0 + S, lo:lo + D_K]
            vh = v[r0:r0 + S, lo:lo + D_K]

            # q @ k^T without materializing a transpose (contract dim1 / dim1).
            s = lax.dot_general(qh, kh, (((1,), (1,)), ((), ())),
                                preferred_element_type=jnp.float32)
            s = s * scale + amask_b
            s = s - jnp.max(s, axis=-1, keepdims=True)         # stable softmax
            p = jnp.exp(s)
            p = p * pl.reciprocal(jnp.sum(p, axis=-1, keepdims=True), approx=False)

            ctx = jnp.dot(p, vh, preferred_element_type=jnp.float32)   # (S, Dk)
            # Accumulate straight into the output projection via a sublane
            # slice of Wo — replaces the head lane-concat.
            part = jnp.dot(ctx, wo_ref[lo:lo + D_K, :],
                           preferred_element_type=jnp.float32)
            out_b = part if out_b is None else out_b + part

        o_ref[r0:r0 + S, :] = out_b + bo_row


# --------------------------------- wrapper ----------------------------------

def multi_head_attention(query, key, value, mask, params):
    """MultiHeadedAttention.forward (eval mode: dropout = identity)."""
    B, S, D = query.shape
    assert D == D_MODEL

    # Fold batch into rows for the projections (layout plumbing, host side).
    xq = query.reshape(B * S, D)
    xk = key.reshape(B * S, D)
    xv = value.reshape(B * S, D)

    # Stack Q/K/V projection weights -> single streamed operand.
    wqkv = jnp.stack([params["wq"], params["wk"], params["wv"]])              # (3, D, D)
    bqkv = jnp.stack([params["bq"], params["bk"], params["bv"]])[:, None, :]  # (3, 1, D)

    # Additive float mask, fully broadcast host-side: 0 visible, -1e9 masked.
    amask = jnp.broadcast_to(
        jnp.where(mask == 0, jnp.float32(-1e9), jnp.float32(0.0)), (B, S, S))

    out2d = pl.pallas_call(
        _mha_kernel,
        out_shape=jax.ShapeDtypeStruct((B * S, D), jnp.float32),
    )(xq, xk, xv, amask, wqkv, bqkv, params["wo"], params["bo"].reshape(1, D))

    return out2d.reshape(B, S, D)


# ---------------------------- pure-JAX reference ----------------------------

def _ref_mha(query, key, value, mask, params):
    B, S, _ = query.shape
    q = (query @ params["wq"] + params["bq"]).reshape(B, S, N_HEADS, D_K).transpose(0, 2, 1, 3)
    k = (key @ params["wk"] + params["bk"]).reshape(B, S, N_HEADS, D_K).transpose(0, 2, 1, 3)
    v = (value @ params["wv"] + params["bv"]).reshape(B, S, N_HEADS, D_K).transpose(0, 2, 1, 3)
    s = jnp.einsum("bhqd,bhkd->bhqk", q, k) / math.sqrt(D_K)
    s = jnp.where(mask[:, None, :, :] == 0, -1e9, s)
    p = jax.nn.softmax(s, axis=-1)
    o = jnp.einsum("bhqk,bhkd->bhqd", p, v).transpose(0, 2, 1, 3).reshape(B, S, D_MODEL)
    return o @ params["wo"] + params["bo"]


# ------------------------------- params -------------------------------------

def init_params(key):
    keys = jax.random.split(key, 8)

    def w(k, shape, fan_in):
        return jax.random.normal(k, shape, jnp.float32) / math.sqrt(fan_in)

    return dict(
        wq=w(keys[0], (D_MODEL, D_MODEL), D_MODEL), bq=0.01 * w(keys[1], (D_MODEL,), 1.0),
        wk=w(keys[2], (D_MODEL, D_MODEL), D_MODEL), bk=0.01 * w(keys[3], (D_MODEL,), 1.0),
        wv=w(keys[4], (D_MODEL, D_MODEL), D_MODEL), bv=0.01 * w(keys[5], (D_MODEL,), 1.0),
        wo=w(keys[6], (D_MODEL, D_MODEL), D_MODEL), bo=0.01 * w(keys[7], (D_MODEL,), 1.0),
    )


# --------------------------------- main --------------------------------------

if __name__ == "__main__":
    B, S = 2, 8
    root = jax.random.PRNGKey(0)
    kq, kk, kv, kp = jax.random.split(root, 4)
    query = jax.random.normal(kq, (B, S, D_MODEL), jnp.float32)
    key_in = jax.random.normal(kk, (B, S, D_MODEL), jnp.float32)
    value = jax.random.normal(kv, (B, S, D_MODEL), jnp.float32)
    # src mask [B, 1, S]: batch 0 fully visible, batch 1 has the last key masked.
    mask = jnp.ones((B, 1, S), jnp.int32).at[1, 0, S - 1].set(0)

    params = init_params(kp)

    out = jax.block_until_ready(
        multi_head_attention(query, key_in, value, mask, params))
    ref = _ref_mha(query, key_in, value, mask, params)

    assert out.shape == (B, S, D_MODEL)
    max_err = float(jnp.max(jnp.abs(out - ref)))
    assert jnp.allclose(out, ref, atol=1e-4, rtol=1e-4), max_err
    print("KERNEL_OK")
</pallas_src>

<mosaic_0001>
module attributes {stable_mosaic.version = 11 : i64} {
  func.func @_mha_kernel(%arg0: memref<16x32xf32, #tpu.memory_space<vmem>>, %arg1: memref<16x32xf32, #tpu.memory_space<vmem>>, %arg2: memref<16x32xf32, #tpu.memory_space<vmem>>, %arg3: memref<2x8x8xf32, #tpu.memory_space<vmem>>, %arg4: memref<3x32x32xf32, #tpu.memory_space<vmem>>, %arg5: memref<3x1x32xf32, #tpu.memory_space<vmem>>, %arg6: memref<32x32xf32, #tpu.memory_space<vmem>>, %arg7: memref<1x32xf32, #tpu.memory_space<vmem>>, %arg8: memref<16x32xf32, #tpu.memory_space<vmem>>) attributes {dimension_semantics = [], scalar_prefetch = 0 : i64, scratch_operands = 0 : i64, tpu.core_type = #tpu.core_type<tc>} {
    %c0 = arith.constant 0 : index
    %c0_0 = arith.constant 0 : index
    %0 = vector.load %arg0[%c0, %c0_0] : memref<16x32xf32, #tpu.memory_space<vmem>>, vector<16x32xf32>
    %c0_1 = arith.constant 0 : index
    %c0_2 = arith.constant 0 : index
    %c0_3 = arith.constant 0 : index
    %1 = vector.load %arg4[%c0_1, %c0_2, %c0_3] : memref<3x32x32xf32, #tpu.memory_space<vmem>>, vector<1x32x32xf32>
    %2 = vector.shape_cast %1 : vector<1x32x32xf32> to vector<32x32xf32>
    %cst = arith.constant dense<0.000000e+00> : vector<16x32xf32>
    %3 = tpu.matmul %0, %2, %cst {dimension_numbers = #tpu.dot_dimension_numbers<[1], [0], [0], [1], [0, 0, 1, 1], [], []>} : vector<16x32xf32>, vector<32x32xf32>, vector<16x32xf32> -> vector<16x32xf32>
    %c0_4 = arith.constant 0 : index
    %c0_5 = arith.constant 0 : index
    %c0_6 = arith.constant 0 : index
    %4 = vector.load %arg5[%c0_4, %c0_5, %c0_6] : memref<3x1x32xf32, #tpu.memory_space<vmem>>, vector<1x1x32xf32>
    %5 = vector.shape_cast %4 : vector<1x1x32xf32> to vector<1x32xf32>
    %6 = vector.broadcast %5 : vector<1x32xf32> to vector<16x32xf32>
    %7 = arith.addf %3, %6 : vector<16x32xf32>
    %c0_7 = arith.constant 0 : index
    %c0_8 = arith.constant 0 : index
    %8 = vector.load %arg1[%c0_7, %c0_8] : memref<16x32xf32, #tpu.memory_space<vmem>>, vector<16x32xf32>
    %c1 = arith.constant 1 : index
    %c0_9 = arith.constant 0 : index
    %c0_10 = arith.constant 0 : index
    %9 = vector.load %arg4[%c1, %c0_9, %c0_10] : memref<3x32x32xf32, #tpu.memory_space<vmem>>, vector<1x32x32xf32>
    %10 = vector.shape_cast %9 : vector<1x32x32xf32> to vector<32x32xf32>
    %cst_11 = arith.constant dense<0.000000e+00> : vector<16x32xf32>
    %11 = tpu.matmul %8, %10, %cst_11 {dimension_numbers = #tpu.dot_dimension_numbers<[1], [0], [0], [1], [0, 0, 1, 1], [], []>} : vector<16x32xf32>, vector<32x32xf32>, vector<16x32xf32> -> vector<16x32xf32>
    %c1_12 = arith.constant 1 : index
    %c0_13 = arith.constant 0 : index
    %c0_14 = arith.constant 0 : index
    %12 = vector.load %arg5[%c1_12, %c0_13, %c0_14] : memref<3x1x32xf32, #tpu.memory_space<vmem>>, vector<1x1x32xf32>
    %13 = vector.shape_cast %12 : vector<1x1x32xf32> to vector<1x32xf32>
    %14 = vector.broadcast %13 : vector<1x32xf32> to vector<16x32xf32>
    %15 = arith.addf %11, %14 : vector<16x32xf32>
    %c0_15 = arith.constant 0 : index
    %c0_16 = arith.constant 0 : index
    %16 = vector.load %arg2[%c0_15, %c0_16] : memref<16x32xf32, #tpu.memory_space<vmem>>, vector<16x32xf32>
    %c2 = arith.constant 2 : index
    %c0_17 = arith.constant 0 : index
    %c0_18 = arith.constant 0 : index
    %17 = vector.load %arg4[%c2, %c0_17, %c0_18] : memref<3x32x32xf32, #tpu.memory_space<vmem>>, vector<1x32x32xf32>
    %18 = vector.shape_cast %17 : vector<1x32x32xf32> to vector<32x32xf32>
    %cst_19 = arith.constant dense<0.000000e+00> : vector<16x32xf32>
    %19 = tpu.matmul %16, %18, %cst_19 {dimension_numbers = #tpu.dot_dimension_numbers<[1], [0], [0], [1], [0, 0, 1, 1], [], []>} : vector<16x32xf32>, vector<32x32xf32>, vector<16x32xf32> -> vector<16x32xf32>
    %c2_20 = arith.constant 2 : index
    %c0_21 = arith.constant 0 : index
    %c0_22 = arith.constant 0 : index
    %20 = vector.load %arg5[%c2_20, %c0_21, %c0_22] : memref<3x1x32xf32, #tpu.memory_space<vmem>>, vector<1x1x32xf32>
    %21 = vector.shape_cast %20 : vector<1x1x32xf32> to vector<1x32xf32>
    %22 = vector.broadcast %21 : vector<1x32xf32> to vector<16x32xf32>
    %23 = arith.addf %19, %22 : vector<16x32xf32>
    %c0_23 = arith.constant 0 : index
    %c0_24 = arith.constant 0 : index
    %24 = vector.load %arg7[%c0_23, %c0_24] : memref<1x32xf32, #tpu.memory_space<vmem>>, vector<1x32xf32>
    %c0_25 = arith.constant 0 : index
    %c0_26 = arith.constant 0 : index
    %c0_27 = arith.constant 0 : index
    %25 = vector.load %arg3[%c0_25, %c0_26, %c0_27] : memref<2x8x8xf32, #tpu.memory_space<vmem>>, vector<1x8x8xf32>
    %26 = vector.shape_cast %25 : vector<1x8x8xf32> to vector<8x8xf32>
    %27 = vector.extract_strided_slice %7 {offsets = [0, 0], sizes = [8, 8], strides = [1, 1]} : vector<16x32xf32> to vector<8x8xf32>
    %28 = vector.extract_strided_slice %15 {offsets = [0, 0], sizes = [8, 8], strides = [1, 1]} : vector<16x32xf32> to vector<8x8xf32>
    %29 = vector.extract_strided_slice %23 {offsets = [0, 0], sizes = [8, 8], strides = [1, 1]} : vector<16x32xf32> to vector<8x8xf32>
    %cst_28 = arith.constant dense<0.000000e+00> : vector<8x8xf32>
    %30 = tpu.matmul %27, %28, %cst_28 {dimension_numbers = #tpu.dot_dimension_numbers<[1], [1], [0], [0], [0, 0, 1, 0], [], []>} : vector<8x8xf32>, vector<8x8xf32>, vector<8x8xf32> -> vector<8x8xf32>
    %cst_29 = arith.constant 0.353553385 : f32
    %31 = vector.broadcast %cst_29 : f32 to vector<8x8xf32>
    %32 = arith.mulf %30, %31 : vector<8x8xf32>
    %33 = arith.addf %32, %26 : vector<8x8xf32>
    %cst_30 = arith.constant dense<0xFF800000> : vector<8xf32>
    %34 = vector.multi_reduction <maximumf>, %33, %cst_30 [1] : vector<8x8xf32> to vector<8xf32>
    %35 = vector.shape_cast %34 : vector<8xf32> to vector<8x1xf32>
    %36 = vector.broadcast %35 : vector<8x1xf32> to vector<8x8xf32>
    %37 = arith.subf %33, %36 : vector<8x8xf32>
    %38 = math.exp %37 : vector<8x8xf32>
    %cst_31 = arith.constant dense<0.000000e+00> : vector<8xf32>
    %39 = vector.multi_reduction <add>, %38, %cst_31 [1] : vector<8x8xf32> to vector<8xf32>
    %40 = vector.shape_cast %39 : vector<8xf32> to vector<8x1xf32>
    %41 = tpu.reciprocal %40 : vector<8x1xf32> -> vector<8x1xf32>
    %42 = vector.broadcast %41 : vector<8x1xf32> to vector<8x8xf32>
    %43 = arith.mulf %38, %42 : vector<8x8xf32>
    %cst_32 = arith.constant dense<0.000000e+00> : vector<8x8xf32>
    %44 = tpu.matmul %43, %29, %cst_32 {dimension_numbers = #tpu.dot_dimension_numbers<[1], [0], [0], [1], [0, 0, 1, 1], [], []>} : vector<8x8xf32>, vector<8x8xf32>, vector<8x8xf32> -> vector<8x8xf32>
    %c0_33 = arith.constant 0 : index
    %c0_34 = arith.constant 0 : index
    %45 = vector.load %arg6[%c0_33, %c0_34] : memref<32x32xf32, #tpu.memory_space<vmem>>, vector<8x32xf32>
    %cst_35 = arith.constant dense<0.000000e+00> : vector<8x32xf32>
    %46 = tpu.matmul %44, %45, %cst_35 {dimension_numbers = #tpu.dot_dimension_numbers<[1], [0], [0], [1], [0, 0, 1, 1], [], []>} : vector<8x8xf32>, vector<8x32xf32>, vector<8x32xf32> -> vector<8x32xf32>
    %47 = vector.extract_strided_slice %7 {offsets = [0, 8], sizes = [8, 8], strides = [1, 1]} : vector<16x32xf32> to vector<8x8xf32>
    %48 = vector.extract_strided_slice %15 {offsets = [0, 8], sizes = [8, 8], strides = [1, 1]} : vector<16x32xf32> to vector<8x8xf32>
    %49 = vector.extract_strided_slice %23 {offsets = [0, 8], sizes = [8, 8], strides = [1, 1]} : vector<16x32xf32> to vector<8x8xf32>
    %cst_36 = arith.constant dense<0.000000e+00> : vector<8x8xf32>
    %50 = tpu.matmul %47, %48, %cst_36 {dimension_numbers = #tpu.dot_dimension_numbers<[1], [1], [0], [0], [0, 0, 1, 0], [], []>} : vector<8x8xf32>, vector<8x8xf32>, vector<8x8xf32> -> vector<8x8xf32>
    %cst_37 = arith.constant 0.353553385 : f32
    %51 = vector.broadcast %cst_37 : f32 to vector<8x8xf32>
    %52 = arith.mulf %50, %51 : vector<8x8xf32>
    %53 = arith.addf %52, %26 : vector<8x8xf32>
    %cst_38 = arith.constant dense<0xFF800000> : vector<8xf32>
    %54 = vector.multi_reduction <maximumf>, %53, %cst_38 [1] : vector<8x8xf32> to vector<8xf32>
    %55 = vector.shape_cast %54 : vector<8xf32> to vector<8x1xf32>
    %56 = vector.broadcast %55 : vector<8x1xf32> to vector<8x8xf32>
    %57 = arith.subf %53, %56 : vector<8x8xf32>
    %58 = math.exp %57 : vector<8x8xf32>
    %cst_39 = arith.constant dense<0.000000e+00> : vector<8xf32>
    %59 = vector.multi_reduction <add>, %58, %cst_39 [1] : vector<8x8xf32> to vector<8xf32>
    %60 = vector.shape_cast %59 : vector<8xf32> to vector<8x1xf32>
    %61 = tpu.reciprocal %60 : vector<8x1xf32> -> vector<8x1xf32>
    %62 = vector.broadcast %61 : vector<8x1xf32> to vector<8x8xf32>
    %63 = arith.mulf %58, %62 : vector<8x8xf32>
    %cst_40 = arith.constant dense<0.000000e+00> : vector<8x8xf32>
    %64 = tpu.matmul %63, %49, %cst_40 {dimension_numbers = #tpu.dot_dimension_numbers<[1], [0], [0], [1], [0, 0, 1, 1], [], []>} : vector<8x8xf32>, vector<8x8xf32>, vector<8x8xf32> -> vector<8x8xf32>
    %c8 = arith.constant 8 : index
    %c0_41 = arith.constant 0 : index
    %65 = vector.load %arg6[%c8, %c0_41] : memref<32x32xf32, #tpu.memory_space<vmem>>, vector<8x32xf32>
    %cst_42 = arith.constant dense<0.000000e+00> : vector<8x32xf32>
    %66 = tpu.matmul %64, %65, %cst_42 {dimension_numbers = #tpu.dot_dimension_numbers<[1], [0], [0], [1], [0, 0, 1, 1], [], []>} : vector<8x8xf32>, vector<8x32xf32>, vector<8x32xf32> -> vector<8x32xf32>
    %67 = arith.addf %46, %66 : vector<8x32xf32>
    %68 = vector.extract_strided_slice %7 {offsets = [0, 16], sizes = [8, 8], strides = [1, 1]} : vector<16x32xf32> to vector<8x8xf32>
    %69 = vector.extract_strided_slice %15 {offsets = [0, 16], sizes = [8, 8], strides = [1, 1]} : vector<16x32xf32> to vector<8x8xf32>
    %70 = vector.extract_strided_slice %23 {offsets = [0, 16], sizes = [8, 8], strides = [1, 1]} : vector<16x32xf32> to vector<8x8xf32>
    %cst_43 = arith.constant dense<0.000000e+00> : vector<8x8xf32>
    %71 = tpu.matmul %68, %69, %cst_43 {dimension_numbers = #tpu.dot_dimension_numbers<[1], [1], [0], [0], [0, 0, 1, 0], [], []>} : vector<8x8xf32>, vector<8x8xf32>, vector<8x8xf32> -> vector<8x8xf32>
    %cst_44 = arith.constant 0.353553385 : f32
    %72 = vector.broadcast %cst_44 : f32 to vector<8x8xf32>
    %73 = arith.mulf %71, %72 : vector<8x8xf32>
    %74 = arith.addf %73, %26 : vector<8x8xf32>
    %cst_45 = arith.constant dense<0xFF800000> : vector<8xf32>
    %75 = vector.multi_reduction <maximumf>, %74, %cst_45 [1] : vector<8x8xf32> to vector<8xf32>
    %76 = vector.shape_cast %75 : vector<8xf32> to vector<8x1xf32>
    %77 = vector.broadcast %76 : vector<8x1xf32> to vector<8x8xf32>
    %78 = arith.subf %74, %77 : vector<8x8xf32>
    %79 = math.exp %78 : vector<8x8xf32>
    %cst_46 = arith.constant dense<0.000000e+00> : vector<8xf32>
    %80 = vector.multi_reduction <add>, %79, %cst_46 [1] : vector<8x8xf32> to vector<8xf32>
    %81 = vector.shape_cast %80 : vector<8xf32> to vector<8x1xf32>
    %82 = tpu.reciprocal %81 : vector<8x1xf32> -> vector<8x1xf32>
    %83 = vector.broadcast %82 : vector<8x1xf32> to vector<8x8xf32>
    %84 = arith.mulf %79, %83 : vector<8x8xf32>
    %cst_47 = arith.constant dense<0.000000e+00> : vector<8x8xf32>
    %85 = tpu.matmul %84, %70, %cst_47 {dimension_numbers = #tpu.dot_dimension_numbers<[1], [0], [0], [1], [0, 0, 1, 1], [], []>} : vector<8x8xf32>, vector<8x8xf32>, vector<8x8xf32> -> vector<8x8xf32>
    %c16 = arith.constant 16 : index
    %c0_48 = arith.constant 0 : index
    %86 = vector.load %arg6[%c16, %c0_48] : memref<32x32xf32, #tpu.memory_space<vmem>>, vector<8x32xf32>
    %cst_49 = arith.constant dense<0.000000e+00> : vector<8x32xf32>
    %87 = tpu.matmul %85, %86, %cst_49 {dimension_numbers = #tpu.dot_dimension_numbers<[1], [0], [0], [1], [0, 0, 1, 1], [], []>} : vector<8x8xf32>, vector<8x32xf32>, vector<8x32xf32> -> vector<8x32xf32>
    %88 = arith.addf %67, %87 : vector<8x32xf32>
    %89 = vector.extract_strided_slice %7 {offsets = [0, 24], sizes = [8, 8], strides = [1, 1]} : vector<16x32xf32> to vector<8x8xf32>
    %90 = vector.extract_strided_slice %15 {offsets = [0, 24], sizes = [8, 8], strides = [1, 1]} : vector<16x32xf32> to vector<8x8xf32>
    %91 = vector.extract_strided_slice %23 {offsets = [0, 24], sizes = [8, 8], strides = [1, 1]} : vector<16x32xf32> to vector<8x8xf32>
    %cst_50 = arith.constant dense<0.000000e+00> : vector<8x8xf32>
    %92 = tpu.matmul %89, %90, %cst_50 {dimension_numbers = #tpu.dot_dimension_numbers<[1], [1], [0], [0], [0, 0, 1, 0], [], []>} : vector<8x8xf32>, vector<8x8xf32>, vector<8x8xf32> -> vector<8x8xf32>
    %cst_51 = arith.constant 0.353553385 : f32
    %93 = vector.broadcast %cst_51 : f32 to vector<8x8xf32>
    %94 = arith.mulf %92, %93 : vector<8x8xf32>
    %95 = arith.addf %94, %26 : vector<8x8xf32>
    %cst_52 = arith.constant dense<0xFF800000> : vector<8xf32>
    %96 = vector.multi_reduction <maximumf>, %95, %cst_52 [1] : vector<8x8xf32> to vector<8xf32>
    %97 = vector.shape_cast %96 : vector<8xf32> to vector<8x1xf32>
    %98 = vector.broadcast %97 : vector<8x1xf32> to vector<8x8xf32>
    %99 = arith.subf %95, %98 : vector<8x8xf32>
    %100 = math.exp %99 : vector<8x8xf32>
    %cst_53 = arith.constant dense<0.000000e+00> : vector<8xf32>
    %101 = vector.multi_reduction <add>, %100, %cst_53 [1] : vector<8x8xf32> to vector<8xf32>
    %102 = vector.shape_cast %101 : vector<8xf32> to vector<8x1xf32>
    %103 = tpu.reciprocal %102 : vector<8x1xf32> -> vector<8x1xf32>
    %104 = vector.broadcast %103 : vector<8x1xf32> to vector<8x8xf32>
    %105 = arith.mulf %100, %104 : vector<8x8xf32>
    %cst_54 = arith.constant dense<0.000000e+00> : vector<8x8xf32>
    %106 = tpu.matmul %105, %91, %cst_54 {dimension_numbers = #tpu.dot_dimension_numbers<[1], [0], [0], [1], [0, 0, 1, 1], [], []>} : vector<8x8xf32>, vector<8x8xf32>, vector<8x8xf32> -> vector<8x8xf32>
    %c24 = arith.constant 24 : index
    %c0_55 = arith.constant 0 : index
    %107 = vector.load %arg6[%c24, %c0_55] : memref<32x32xf32, #tpu.memory_space<vmem>>, vector<8x32xf32>
    %cst_56 = arith.constant dense<0.000000e+00> : vector<8x32xf32>
    %108 = tpu.matmul %106, %107, %cst_56 {dimension_numbers = #tpu.dot_dimension_numbers<[1], [0], [0], [1], [0, 0, 1, 1], [], []>} : vector<8x8xf32>, vector<8x32xf32>, vector<8x32xf32> -> vector<8x32xf32>
    %109 = arith.addf %88, %108 : vector<8x32xf32>
    %110 = vector.broadcast %24 : vector<1x32xf32> to vector<8x32xf32>
    %111 = arith.addf %109, %110 : vector<8x32xf32>
    %c0_57 = arith.constant 0 : index
    %c0_58 = arith.constant 0 : index
    %112 = vector.load %arg8[%c0_57, %c0_58] : memref<16x32xf32, #tpu.memory_space<vmem>>, vector<8x32xf32>
    tpu.vector_store %arg8[%c0_57, %c0_58], %111 {strides = array<i32>} : memref<16x32xf32, #tpu.memory_space<vmem>>, vector<8x32xf32>,
    %c1_59 = arith.constant 1 : index
    %c0_60 = arith.constant 0 : index
    %c0_61 = arith.constant 0 : index
    %113 = vector.load %arg3[%c1_59, %c0_60, %c0_61] : memref<2x8x8xf32, #tpu.memory_space<vmem>>, vector<1x8x8xf32>
    %114 = vector.shape_cast %113 : vector<1x8x8xf32> to vector<8x8xf32>
    %115 = vector.extract_strided_slice %7 {offsets = [8, 0], sizes = [8, 8], strides = [1, 1]} : vector<16x32xf32> to vector<8x8xf32>
    %116 = vector.extract_strided_slice %15 {offsets = [8, 0], sizes = [8, 8], strides = [1, 1]} : vector<16x32xf32> to vector<8x8xf32>
    %117 = vector.extract_strided_slice %23 {offsets = [8, 0], sizes = [8, 8], strides = [1, 1]} : vector<16x32xf32> to vector<8x8xf32>
    %cst_62 = arith.constant dense<0.000000e+00> : vector<8x8xf32>
    %118 = tpu.matmul %115, %116, %cst_62 {dimension_numbers = #tpu.dot_dimension_numbers<[1], [1], [0], [0], [0, 0, 1, 0], [], []>} : vector<8x8xf32>, vector<8x8xf32>, vector<8x8xf32> -> vector<8x8xf32>
    %cst_63 = arith.constant 0.353553385 : f32
    %119 = vector.broadcast %cst_63 : f32 to vector<8x8xf32>
    %120 = arith.mulf %118, %119 : vector<8x8xf32>
    %121 = arith.addf %120, %114 : vector<8x8xf32>
    %cst_64 = arith.constant dense<0xFF800000> : vector<8xf32>
    %122 = vector.multi_reduction <maximumf>, %121, %cst_64 [1] : vector<8x8xf32> to vector<8xf32>
    %123 = vector.shape_cast %122 : vector<8xf32> to vector<8x1xf32>
    %124 = vector.broadcast %123 : vector<8x1xf32> to vector<8x8xf32>
    %125 = arith.subf %121, %124 : vector<8x8xf32>
    %126 = math.exp %125 : vector<8x8xf32>
    %cst_65 = arith.constant dense<0.000000e+00> : vector<8xf32>
    %127 = vector.multi_reduction <add>, %126, %cst_65 [1] : vector<8x8xf32> to vector<8xf32>
    %128 = vector.shape_cast %127 : vector<8xf32> to vector<8x1xf32>
    %129 = tpu.reciprocal %128 : vector<8x1xf32> -> vector<8x1xf32>
    %130 = vector.broadcast %129 : vector<8x1xf32> to vector<8x8xf32>
    %131 = arith.mulf %126, %130 : vector<8x8xf32>
    %cst_66 = arith.constant dense<0.000000e+00> : vector<8x8xf32>
    %132 = tpu.matmul %131, %117, %cst_66 {dimension_numbers = #tpu.dot_dimension_numbers<[1], [0], [0], [1], [0, 0, 1, 1], [], []>} : vector<8x8xf32>, vector<8x8xf32>, vector<8x8xf32> -> vector<8x8xf32>
    %c0_67 = arith.constant 0 : index
    %c0_68 = arith.constant 0 : index
    %133 = vector.load %arg6[%c0_67, %c0_68] : memref<32x32xf32, #tpu.memory_space<vmem>>, vector<8x32xf32>
    %cst_69 = arith.constant dense<0.000000e+00> : vector<8x32xf32>
    %134 = tpu.matmul %132, %133, %cst_69 {dimension_numbers = #tpu.dot_dimension_numbers<[1], [0], [0], [1], [0, 0, 1, 1], [], []>} : vector<8x8xf32>, vector<8x32xf32>, vector<8x32xf32> -> vector<8x32xf32>
    %135 = vector.extract_strided_slice %7 {offsets = [8, 8], sizes = [8, 8], strides = [1, 1]} : vector<16x32xf32> to vector<8x8xf32>
    %136 = vector.extract_strided_slice %15 {offsets = [8, 8], sizes = [8, 8], strides = [1, 1]} : vector<16x32xf32> to vector<8x8xf32>
    %137 = vector.extract_strided_slice %23 {offsets = [8, 8], sizes = [8, 8], strides = [1, 1]} : vector<16x32xf32> to vector<8x8xf32>
    %cst_70 = arith.constant dense<0.000000e+00> : vector<8x8xf32>
    %138 = tpu.matmul %135, %136, %cst_70 {dimension_numbers = #tpu.dot_dimension_numbers<[1], [1], [0], [0], [0, 0, 1, 0], [], []>} : vector<8x8xf32>, vector<8x8xf32>, vector<8x8xf32> -> vector<8x8xf32>
    %cst_71 = arith.constant 0.353553385 : f32
    %139 = vector.broadcast %cst_71 : f32 to vector<8x8xf32>
    %140 = arith.mulf %138, %139 : vector<8x8xf32>
    %141 = arith.addf %140, %114 : vector<8x8xf32>
    %cst_72 = arith.constant dense<0xFF800000> : vector<8xf32>
    %142 = vector.multi_reduction <maximumf>, %141, %cst_72 [1] : vector<8x8xf32> to vector<8xf32>
    %143 = vector.shape_cast %142 : vector<8xf32> to vector<8x1xf32>
    %144 = vector.broadcast %143 : vector<8x1xf32> to vector<8x8xf32>
    %145 = arith.subf %141, %144 : vector<8x8xf32>
    %146 = math.exp %145 : vector<8x8xf32>
    %cst_73 = arith.constant dense<0.000000e+00> : vector<8xf32>
    %147 = vector.multi_reduction <add>, %146, %cst_73 [1] : vector<8x8xf32> to vector<8xf32>
    %148 = vector.shape_cast %147 : vector<8xf32> to vector<8x1xf32>
    %149 = tpu.reciprocal %148 : vector<8x1xf32> -> vector<8x1xf32>
    %150 = vector.broadcast %149 : vector<8x1xf32> to vector<8x8xf32>
    %151 = arith.mulf %146, %150 : vector<8x8xf32>
    %cst_74 = arith.constant dense<0.000000e+00> : vector<8x8xf32>
    %152 = tpu.matmul %151, %137, %cst_74 {dimension_numbers = #tpu.dot_dimension_numbers<[1], [0], [0], [1], [0, 0, 1, 1], [], []>} : vector<8x8xf32>, vector<8x8xf32>, vector<8x8xf32> -> vector<8x8xf32>
    %c8_75 = arith.constant 8 : index
    %c0_76 = arith.constant 0 : index
    %153 = vector.load %arg6[%c8_75, %c0_76] : memref<32x32xf32, #tpu.memory_space<vmem>>, vector<8x32xf32>
    %cst_77 = arith.constant dense<0.000000e+00> : vector<8x32xf32>
    %154 = tpu.matmul %152, %153, %cst_77 {dimension_numbers = #tpu.dot_dimension_numbers<[1], [0], [0], [1], [0, 0, 1, 1], [], []>} : vector<8x8xf32>, vector<8x32xf32>, vector<8x32xf32> -> vector<8x32xf32>
    %155 = arith.addf %134, %154 : vector<8x32xf32>
    %156 = vector.extract_strided_slice %7 {offsets = [8, 16], sizes = [8, 8], strides = [1, 1]} : vector<16x32xf32> to vector<8x8xf32>
    %157 = vector.extract_strided_slice %15 {offsets = [8, 16], sizes = [8, 8], strides = [1, 1]} : vector<16x32xf32> to vector<8x8xf32>
    %158 = vector.extract_strided_slice %23 {offsets = [8, 16], sizes = [8, 8], strides = [1, 1]} : vector<16x32xf32> to vector<8x8xf32>
    %cst_78 = arith.constant dense<0.000000e+00> : vector<8x8xf32>
    %159 = tpu.matmul %156, %157, %cst_78 {dimension_numbers = #tpu.dot_dimension_numbers<[1], [1], [0], [0], [0, 0, 1, 0], [], []>} : vector<8x8xf32>, vector<8x8xf32>, vector<8x8xf32> -> vector<8x8xf32>
    %cst_79 = arith.constant 0.353553385 : f32
    %160 = vector.broadcast %cst_79 : f32 to vector<8x8xf32>
    %161 = arith.mulf %159, %160 : vector<8x8xf32>
    %162 = arith.addf %161, %114 : vector<8x8xf32>
    %cst_80 = arith.constant dense<0xFF800000> : vector<8xf32>
    %163 = vector.multi_reduction <maximumf>, %162, %cst_80 [1] : vector<8x8xf32> to vector<8xf32>
    %164 = vector.shape_cast %163 : vector<8xf32> to vector<8x1xf32>
    %165 = vector.broadcast %164 : vector<8x1xf32> to vector<8x8xf32>
    %166 = arith.subf %162, %165 : vector<8x8xf32>
    %167 = math.exp %166 : vector<8x8xf32>
    %cst_81 = arith.constant dense<0.000000e+00> : vector<8xf32>
    %168 = vector.multi_reduction <add>, %167, %cst_81 [1] : vector<8x8xf32> to vector<8xf32>
    %169 = vector.shape_cast %168 : vector<8xf32> to vector<8x1xf32>
    %170 = tpu.reciprocal %169 : vector<8x1xf32> -> vector<8x1xf32>
    %171 = vector.broadcast %170 : vector<8x1xf32> to vector<8x8xf32>
    %172 = arith.mulf %167, %171 : vector<8x8xf32>
    %cst_82 = arith.constant dense<0.000000e+00> : vector<8x8xf32>
    %173 = tpu.matmul %172, %158, %cst_82 {dimension_numbers = #tpu.dot_dimension_numbers<[1], [0], [0], [1], [0, 0, 1, 1], [], []>} : vector<8x8xf32>, vector<8x8xf32>, vector<8x8xf32> -> vector<8x8xf32>
    %c16_83 = arith.constant 16 : index
    %c0_84 = arith.constant 0 : index
    %174 = vector.load %arg6[%c16_83, %c0_84] : memref<32x32xf32, #tpu.memory_space<vmem>>, vector<8x32xf32>
    %cst_85 = arith.constant dense<0.000000e+00> : vector<8x32xf32>
    %175 = tpu.matmul %173, %174, %cst_85 {dimension_numbers = #tpu.dot_dimension_numbers<[1], [0], [0], [1], [0, 0, 1, 1], [], []>} : vector<8x8xf32>, vector<8x32xf32>, vector<8x32xf32> -> vector<8x32xf32>
    %176 = arith.addf %155, %175 : vector<8x32xf32>
    %177 = vector.extract_strided_slice %7 {offsets = [8, 24], sizes = [8, 8], strides = [1, 1]} : vector<16x32xf32> to vector<8x8xf32>
    %178 = vector.extract_strided_slice %15 {offsets = [8, 24], sizes = [8, 8], strides = [1, 1]} : vector<16x32xf32> to vector<8x8xf32>
    %179 = vector.extract_strided_slice %23 {offsets = [8, 24], sizes = [8, 8], strides = [1, 1]} : vector<16x32xf32> to vector<8x8xf32>
    %cst_86 = arith.constant dense<0.000000e+00> : vector<8x8xf32>
    %180 = tpu.matmul %177, %178, %cst_86 {dimension_numbers = #tpu.dot_dimension_numbers<[1], [1], [0], [0], [0, 0, 1, 0], [], []>} : vector<8x8xf32>, vector<8x8xf32>, vector<8x8xf32> -> vector<8x8xf32>
    %cst_87 = arith.constant 0.353553385 : f32
    %181 = vector.broadcast %cst_87 : f32 to vector<8x8xf32>
    %182 = arith.mulf %180, %181 : vector<8x8xf32>
    %183 = arith.addf %182, %114 : vector<8x8xf32>
    %cst_88 = arith.constant dense<0xFF800000> : vector<8xf32>
    %184 = vector.multi_reduction <maximumf>, %183, %cst_88 [1] : vector<8x8xf32> to vector<8xf32>
    %185 = vector.shape_cast %184 : vector<8xf32> to vector<8x1xf32>
    %186 = vector.broadcast %185 : vector<8x1xf32> to vector<8x8xf32>
    %187 = arith.subf %183, %186 : vector<8x8xf32>
    %188 = math.exp %187 : vector<8x8xf32>
    %cst_89 = arith.constant dense<0.000000e+00> : vector<8xf32>
    %189 = vector.multi_reduction <add>, %188, %cst_89 [1] : vector<8x8xf32> to vector<8xf32>
    %190 = vector.shape_cast %189 : vector<8xf32> to vector<8x1xf32>
    %191 = tpu.reciprocal %190 : vector<8x1xf32> -> vector<8x1xf32>
    %192 = vector.broadcast %191 : vector<8x1xf32> to vector<8x8xf32>
    %193 = arith.mulf %188, %192 : vector<8x8xf32>
    %cst_90 = arith.constant dense<0.000000e+00> : vector<8x8xf32>
    %194 = tpu.matmul %193, %179, %cst_90 {dimension_numbers = #tpu.dot_dimension_numbers<[1], [0], [0], [1], [0, 0, 1, 1], [], []>} : vector<8x8xf32>, vector<8x8xf32>, vector<8x8xf32> -> vector<8x8xf32>
    %c24_91 = arith.constant 24 : index
    %c0_92 = arith.constant 0 : index
    %195 = vector.load %arg6[%c24_91, %c0_92] : memref<32x32xf32, #tpu.memory_space<vmem>>, vector<8x32xf32>
    %cst_93 = arith.constant dense<0.000000e+00> : vector<8x32xf32>
    %196 = tpu.matmul %194, %195, %cst_93 {dimension_numbers = #tpu.dot_dimension_numbers<[1], [0], [0], [1], [0, 0, 1, 1], [], []>} : vector<8x8xf32>, vector<8x32xf32>, vector<8x32xf32> -> vector<8x32xf32>
    %197 = arith.addf %176, %196 : vector<8x32xf32>
    %198 = vector.broadcast %24 : vector<1x32xf32> to vector<8x32xf32>
    %199 = arith.addf %197, %198 : vector<8x32xf32>
    %c8_94 = arith.constant 8 : index
    %c0_95 = arith.constant 0 : index
    %200 = vector.load %arg8[%c8_94, %c0_95] : memref<16x32xf32, #tpu.memory_space<vmem>>, vector<8x32xf32>
    tpu.vector_store %arg8[%c8_94, %c0_95], %199 {strides = array<i32>} : memref<16x32xf32, #tpu.memory_space<vmem>>, vector<8x32xf32>,
    return
  }
}

</mosaic_0001>

<bundles_post_ra>
// kernel: tpu_custom_call.1
= control target key start
LH: loop header
LB: loop body
LE: loop exit
PB: predicated region body
PF: predicated region fallthrough
CT: control target
= control target key end

     0   :  { %13 = vsyncpa [#allocation3], 0  ;;  %s3144_s0 = inlined_call_operand.hbm [shape: f32[16,32], index: 0, kind: input, shape index: {}]   ;;  %s3145_s1 = inlined_call_operand.hbm [shape: f32[16,32], index: 1, kind: input, shape index: {}]   ;;  %s3146_s2 = inlined_call_operand.hbm [shape: f32[16,32], index: 2, kind: input, shape index: {}]   ;;  %s3147_s3 = inlined_call_operand.hbm [shape: f32[2,8,8], index: 3, kind: input, shape index: {}]   ;;  %s3148_s4 = inlined_call_operand.hbm [shape: f32[3,32,32], index: 4, kind: input, shape index: {}]   ;;  %s3149_s5 = inlined_call_operand.vmem [shape: f32[3,1,32], index: 5, kind: input, shape index: {}]   ;;  %s3150_s6 = inlined_call_operand.hbm [shape: f32[32,32], index: 6, kind: input, shape index: {}]   ;;  %s3151_s7 = inlined_call_operand.vmem [shape: f32[1,32], index: 7, kind: input, shape index: {}]   ;;  %s3152_s8 = inlined_call_operand.hbm [shape: f32[16,32], index: 8, kind: output, shape index: {}]  }
   0x1   :  { %14 = vsyncpa [#allocation6], 0 }
   0x2   :  { %15 = vsyncpa [#allocation9], 0 }
   0x3   :  { %16 = vsyncpa [#allocation12], 0 }
   0x4   :  { %17 = vsyncpa [#allocation4], 0  ;;  %s2817_s27 = smov [#allocation5]   ;;  %s2818_s29 = smov [#allocation8]  }
   0x5   :  { %s35_s28 = sshll.u32 %s2817_s27, 4  ;;  %s59_s30 = sshll.u32 %s2818_s29, 4  ;;  %s36_s28 = int_to_ptr.vmem [resolvable:$true] %s35_s28  ;;  %s60_s30 = int_to_ptr.vmem [resolvable:$true] %s59_s30 }
   0x6   :  { %s2675_s9 = scalar_lea.vmem %s36_s28, 256  ;;  %p2680_p1 = scmp.lt.s32.totalorder %s36_s28, %s36_s28 }
   0x7   :  { %p2676_p0 = scmp.ne.s32.totalorder %s36_s28, %s2675_s9  ;;  %p2681_p2 = scmp.lt.s32.totalorder %s2675_s9, %s2675_s9 }
   0x9   :  { %p2682_p3 = por %p2681_p2, %p2680_p1 }
   0xb   :  { %p2683_p4 = pnand %p2682_p3, %p2676_p0 }
   0xd   :  { %2686 = shalt.err (!%p2683_p4)
}
   0xe   :  { %s2819_s10 = smov 128   ;;  %s2820_s11 = smov 8  }
   0xf   :  { %41 = dma.hbm_to_vmem [thread:$0]  %s3145_s1, 256, %s36_s28, [#allocation6], %s2819_s10, %s2819_s10, %s2820_s11  }
  0x10   :  { %s2695_s14 = scalar_lea.vmem %s60_s30, 256  ;;  %p2700_p6 = scmp.lt.s32.totalorder %s60_s30, %s60_s30 }
  0x11   :  { %p2696_p5 = scmp.ne.s32.totalorder %s60_s30, %s2695_s14  ;;  %p2701_p7 = scmp.lt.s32.totalorder %s2695_s14, %s2695_s14 }
  0x13   :  { %p2702_p8 = por %p2701_p7, %p2700_p6 }
  0x15   :  { %p2703_p9 = pnand %p2702_p8, %p2696_p5 }
  0x17   :  { %2706 = shalt.err (!%p2703_p9)
}
  0x18   :  { %65 = dma.hbm_to_vmem [thread:$0]  %s3147_s3, 256, %s60_s30, [#allocation9], %s2819_s10, %s2819_s10, %s2820_s11  }
  0x19   :  { %s2821_s17 = smov [#allocation2]   ;;  %s2822_s19 = smov [#allocation7]  }
  0x1a   :  { %s23_s18 = sshll.u32 %s2821_s17, 4  ;;  %s47_s20 = sshll.u32 %s2822_s19, 4  ;;  %s24_s18 = int_to_ptr.vmem [resolvable:$true] %s23_s18  ;;  %s48_s20 = int_to_ptr.vmem [resolvable:$true] %s47_s20 }
  0x1b   :  { %s2715_s1 = scalar_lea.vmem %s24_s18, 256  ;;  %p2720_p11 = scmp.lt.s32.totalorder %s24_s18, %s24_s18 }
  0x1c   :  { %p2716_p10 = scmp.ne.s32.totalorder %s24_s18, %s2715_s1  ;;  %p2721_p12 = scmp.lt.s32.totalorder %s2715_s1, %s2715_s1 }
  0x1e   :  { %p2722_p13 = por %p2721_p12, %p2720_p11 }
  0x20   :  { %p2723_p0 = pnand %p2722_p13, %p2716_p10 }
  0x22   :  { %2726 = shalt.err (!%p2723_p0)
}
  0x23   :  { %29 = dma.hbm_to_vmem [thread:$0]  %s3144_s0, 256, %s24_s18, [#allocation3], %s2819_s10, %s2819_s10, %s2820_s11  }
  0x24   :  { %s2735_s3 = scalar_lea.vmem %s48_s20, 256  ;;  %p2740_p2 = scmp.lt.s32.totalorder %s48_s20, %s48_s20 }
  0x25   :  { %p2736_p1 = scmp.ne.s32.totalorder %s48_s20, %s2735_s3  ;;  %p2741_p3 = scmp.lt.s32.totalorder %s2735_s3, %s2735_s3 }
  0x27   :  { %p2742_p4 = por %p2741_p3, %p2740_p2 }
  0x29   :  { %p2743_p5 = pnand %p2742_p4, %p2736_p1 }
  0x2b   :  { %2746 = shalt.err (!%p2743_p5)
}
  0x2c   :  { %53 = dma.hbm_to_vmem [thread:$0]  %s3146_s2, 256, %s48_s20, [#allocation6], %s2819_s10, %s2819_s10, %s2820_s11  }
  0x2d   :  { %s2823_s25 = smov [#allocation10]   ;;  %s2824_s27 = smov [#allocation11]  }
  0x2e   :  { %s71_s26 = sshll.u32 %s2823_s25, 4  ;;  %s85_s28 = sshll.u32 %s2824_s27, 4  ;;  %s72_s26 = int_to_ptr.vmem [resolvable:$true] %s71_s26  ;;  %s86_s28 = int_to_ptr.vmem [resolvable:$true] %s85_s28 }
  0x2f   :  { %s2755_s0 = scalar_lea.vmem %s72_s26, 1536  ;;  %p2760_p7 = scmp.lt.s32.totalorder %s72_s26, %s72_s26 }
  0x30   :  { %p2756_p6 = scmp.ne.s32.totalorder %s72_s26, %s2755_s0  ;;  %p2761_p8 = scmp.lt.s32.totalorder %s2755_s0, %s2755_s0 }
  0x32   :  { %p2762_p9 = por %p2761_p8, %p2760_p7 }
  0x34   :  { %p2763_p10 = pnand %p2762_p9, %p2756_p6 }
  0x36   :  { %2766 = shalt.err (!%p2763_p10)
}
  0x37   :  { %77 = dma.hbm_to_vmem [thread:$0]  %s3148_s4, 1536, %s72_s26, [#allocation9], %s2819_s10, %s2819_s10, %s2820_s11  }
  0x38   :  { %s2775_s2 = scalar_lea.vmem %s86_s28, 512  ;;  %p2780_p12 = scmp.lt.s32.totalorder %s86_s28, %s86_s28 }
  0x39   :  { %p2776_p11 = scmp.ne.s32.totalorder %s86_s28, %s2775_s2  ;;  %p2781_p13 = scmp.lt.s32.totalorder %s2775_s2, %s2775_s2 }
  0x3b   :  { %p2782_p0 = por %p2781_p13, %p2780_p12 }
  0x3d   :  { %p2783_p1 = pnand %p2782_p0, %p2776_p11 }
  0x3f   :  { %2786 = shalt.err (!%p2783_p1)
}
  0x40   :  { %91 = dma.hbm_to_vmem [thread:$0]  %s3150_s6, 512, %s86_s28, [#allocation12], %s2819_s10, %s2819_s10, %s2820_s11  }
  0x41   :  { %2807 = dma.done.wait [#allocation3], 256  }
  0x42   :  { %2808 = vsyncadd [#allocation3], 4294967040 }
  0x43   :  { %2809 = dma.done.wait [#allocation6], 512  }
  0x44   :  { %2810 = vsyncadd [#allocation6], 4294966784 }
  0x45   :  { %2811 = dma.done.wait [#allocation9], 1792  }
  0x46   :  { %2812 = vsyncadd [#allocation9], 4294965504 }
  0x47   :  { %2813 = dma.done.wait [#allocation12], 512  }
  0x48   :  { %2814 = vsyncadd [#allocation12], 4294966784  ;;  %v213_v0 = vld [vmem:[#allocation10 + $0x38] sm:$0xff]  ;;  %v212_v2 = vld [vmem:[#allocation10 + $0x30] sm:$0xff]  ;;  %vm125_vm0 = vcmask 261120   ;;  %v2825_v12 = vmov 0.0  }
  0x49   :  { %v117_v1 = vld [vmem:[#allocation10 + $0x18] sm:$0xff]  ;;  %2479 = vmatprep.subr.mxu1 %v213_v0  ;;  %v116_v3 = vld [vmem:[#allocation10 + $0x10] sm:$0xff]  ;;  %v211_v4 = vld [vmem:[#allocation10 + $0x28] sm:$0xff]  ;;  %vm2826_vm1 = vmmov 0   ;;  %vm401_vm2 = vcmask 64512   ;;  %s2827_s15 = smov 120  }
  0x4a   :  { %2468 = vmatprep.subr.mxu0 %v117_v1  ;;  %2480 = vmatpush3.msra.mxu1 %v213_v0  ;;  %v115_v5 = vld [vmem:[#allocation10 + $0x8] sm:$0xff]  ;;  %v210_v6 = vld [vmem:[#allocation10 + $0x20] sm:$0xff]  ;;  %v207_v7 = vld [vmem:[#allocation5] sm:$0xff]  ;;  %s2829_s18 = smov 104  }
  0x4b   :  { %2469 = vmatpush3.msra.mxu0 %v117_v1  ;;  %2481 = vmatprep.subr.mxu1 %v212_v2  ;;  %v114_v8 = vld [vmem:[#allocation10] sm:$0xff]  ;;  %v208_v9 = vld [vmem:[#allocation5 + $0x8] sm:$0xff]  ;;  %v113_v11 = vld [vmem:[#allocation2 + $0x8] sm:$0xff] }
  0x4c   :  { %2470 = vmatprep.subr.mxu0 %v116_v3  ;;  %2482 = vmatpush3.msra.mxu1 %v212_v2  ;;  %v112_v10 = vld [vmem:[#allocation2] sm:$0xff]  ;;  %v309_v13 = vld [vmem:[#allocation10 + $0x58] sm:$0xff]  ;;  %v308_v14 = vld [vmem:[#allocation10 + $0x50] sm:$0xff] }
  0x4d   :  { %2471 = vmatpush3.msra.mxu0 %v116_v3  ;;  %2483 = vmatprep.subr.mxu1 %v211_v4  ;;  %v303_v15 = vld [vmem:[#allocation7] sm:$0xff]  ;;  %v307_v16 = vld [vmem:[#allocation10 + $0x48] sm:$0xff]  ;;  %v2963_v37 = vld [vmem:[#allocation8] sm:$0xff] }
  0x4e   :  { %2472 = vmatprep.subr.mxu0 %v115_v5  ;;  %2484 = vmatpush3.msra.mxu1 %v211_v4  ;;  %v306_v17 = vld [vmem:[#allocation10 + $0x40] sm:$0xff]  ;;  %v304_v18 = vld [vmem:[#allocation7 + $0x8] sm:$0xff] }
  0x4f   :  { %2473 = vmatpush3.msra.mxu0 %v115_v5  ;;  %2485 = vmatprep.subr.mxu1 %v210_v6  ;;  %v2362_v19 = vld [vmem:[%s3149_s5 + $0x1] ss:$0 sm:$0xff]  ;;  %v2358_v21 = vld [vmem:[%s3149_s5] ss:$0 sm:$0xff]  ;;  %v2366_v29 = vld [vmem:[%s3149_s5 + $0x2] ss:$0 sm:$0xff] }
  0x50   :  { %2487 = vmatprep.mubr.msk.f32.mxu1 %vm125_vm0, %v207_v7  ;;  %2486 = vmatpush3.msra.mxu1 %v210_v6  ;;  %s2828_s5 = smov 112   ;;  %v2982_v60 = vld [vmem:[#allocation11 + $0x8] sm:$0xff]  ;;  %v2987_v1 = vld [vmem:[#allocation11] sm:$0xff] }
  0x51   :  { %2474 = vmatprep.subr.mxu0 %v114_v8  ;;  %2488 = vmatmul.mubr.msk.f32.vlgmr.msra.gmra.mxu1 %vm125_vm0, %v208_v9 }
  0x52   :  { %2475 = vmatpush3.msra.mxu0 %v114_v8  ;;  %2476 = vmatprep.mubr.msk.f32.mxu0 %vm125_vm0, %v112_v10 }
  0x53   :  { %2477 = vmatmul.mubr.msk.f32.vlgmr.msra.gmra.mxu0 %vm125_vm0, %v113_v11  ;;  %2501 = vmatprep.subr.mxu1 %v2825_v12 }
  0x54   :  { %2503 = vmatprep.mubr.msk.f32.mxu1 %vm2826_vm1, %v2825_v12  ;;  %2490 = vmatprep.subr.mxu0 %v309_v13 }
  0x55   :  { %2491 = vmatpush3.msra.mxu0 %v309_v13  ;;  %2498 = vmatprep.mubr.msk.f32.mxu0 %vm125_vm0, %v303_v15 }
  0x56   :  { %2492 = vmatprep.subr.mxu0 %v308_v14 }
  0x57   :  { %2493 = vmatpush3.msra.mxu0 %v308_v14 }
  0x58   :  { %2494 = vmatprep.subr.mxu0 %v307_v16 }
  0x59   :  { %2495 = vmatpush3.msra.mxu0 %v307_v16 }
  0x5a   :  { %2496 = vmatprep.subr.mxu0 %v306_v17 }
  0x5b   :  { %2497 = vmatpush3.msra.mxu0 %v306_v17 }
  0x5c   :  { %2499 = vmatmul.mubr.msk.f32.vlgmr.msra.gmra.mxu0 %vm125_vm0, %v304_v18  ;;  %2511 = vmatprep.subr.mxu0 %v2825_v12 }
  0x5d   :  { %2513 = vmatprep.mubr.msk.f32.mxu0 %vm2826_vm1, %v2825_v12 }
 0x111   :  { %v2489_v20 = vpop.f32.mrf.mxu1 }
 0x112   :  { %v2930_v22 = vadd.f32 %v2489_v20, %v2362_v19 }
 0x113   :  { %v2478_v23 = vpop.f32.mrf.mxu0  ;;  %v294_v24 = vpop.f32.mrf.mxu1 }
 0x114   :  { %v2932_v25 = vadd.f32 %v2478_v23, %v2358_v21  ;;  %v2934_v26 = vadd.f32 %v2362_v19, %v294_v24 }
 0x115   :  { %v198_v27 = vpop.f32.mrf.mxu0 }
 0x116   :  { %v2936_v28 = vadd.f32 %v2358_v21, %v198_v27  ;;  %567 = vrot.lane.b32.xlu0 %v2934_v26, %s2827_s15  ;;  %2502 = vmatpush3.xpose.msk.msra.mxu1 %vm401_vm2, %v2934_v26  ;;  %v3017_v27 = vld [vmem:[#allocation11 + $0x10] sm:$0xff] }
 0x117   :  { %2506 = vmatprep.subr.mxu1 %v2825_v12 }
 0x119   :  { %2504 = vmatmul.mubr.msk.f32.vlgmr.msra.gmra.mxu1 %vm401_vm2, %v2936_v28 }
 0x11a   :  { %565 = vrot.lane.b32.xlu0 %v2936_v28, %s2827_s15  ;;  %2508 = vmatprep.mubr.msk.f32.mxu1 %vm2826_vm1, %v2825_v12 }
 0x11c   :  { %v2500_v30 = vpop.f32.mrf.mxu0 }
 0x11d   :  { %v2952_v31 = vadd.f32 %v2500_v30, %v2366_v29 }
 0x11e   :  { %v390_v32 = vpop.f32.mrf.mxu0 }
 0x11f   :  { %v2954_v33 = vadd.f32 %v2366_v29, %v390_v32 }
 0x121   :  { %2507 = vmatpush3.msra.mxu1 %v2954_v33 }
 0x122   :  { %2516 = vmatprep.subr.mxu1 %v2825_v12 }
 0x188   :  { %v568_v34 = vpop.permute.xlu0 %567 }
 0x189   :  { %2512 = vmatpush3.xpose.msk.msra.mxu0 %vm401_vm2, %v568_v34 }
 0x18a   :  { %2521 = vmatprep.subr.mxu0 %v2825_v12 }
 0x18c   :  { %v566_v35 = vpop.permute.xlu0 %565 }
 0x18d   :  { %2514 = vmatmul.mubr.msk.f32.vlgmr.msra.gmra.mxu0 %vm401_vm2, %v566_v35 }
 0x18e   :  { %2523 = vmatprep.mubr.msk.f32.mxu0 %vm2826_vm1, %v2825_v12  ;;  %2522 = vmatpush3.msra.mxu0 %v2982_v60 }
 0x18f   :  { %2531 = vmatprep.subr.mxu0 %v2825_v12 }
 0x1d9   :  { %v474_v36 = vpop.f32.mrf.mxu1 }
 0x1da   :  { %v478_v38 = vmul.f32 0.35355338, %v474_v36 }
 0x1db   :  { %v2505_v39 = vpop.f32.mrf.mxu1 }
 0x1dc   :  { %v479_v40 = vadd.f32 %v478_v38, %v2963_v37 }
 0x1de   :  { %v480_v41 = vsel %vm401_vm2, %v479_v40, -inf }
 0x1df   :  { %481 = vmax.xlane.f32.xlu1 %v480_v41 }
 0x24d   :  { %v639_v42 = vpop.f32.mrf.mxu0 }
 0x24e   :  { %v643_v43 = vmul.f32 0.35355338, %v639_v42 }
 0x24f   :  { %v2515_v44 = vpop.f32.mrf.mxu0 }
 0x250   :  { %v644_v45 = vadd.f32 %v643_v43, %v2963_v37 }
 0x252   :  { %v645_v46 = vsel %vm401_vm2, %v644_v45, -inf }
 0x253   :  { %646 = vmax.xlane.f32.xlu1 %v645_v46 }
 0x268   :  { %v482_v47 = vpop.xlane.xlu1 %481 }
 0x269   :  { %v483_v48 = vsub.f32 %v479_v40, %v482_v47 }
 0x26b   :  { %v484_v49 = vmul.f32 1.442695, %v483_v48 }
 0x26d   :  { %2635 = vpow2.f32 %v484_v49 }
 0x27a   :  { %v2636_v50 = vpop.eup %2635 }
 0x27b   :  { %v486_v51 = vsel %vm401_vm2, %v2636_v50, 0.0 }
 0x27c   :  { %487 = vadd.xlane.f32.xlu0 %v486_v51  ;;  %v3038_v51 = vld [vmem:[#allocation11 + $0x18] sm:$0xff] }
 0x292   :  { %971 = vrot.lane.b32.xlu0 %v2954_v33, %s2828_s5 }
 0x2dc   :  { %v647_v52 = vpop.xlane.xlu1 %646 }
 0x2dd   :  { %v648_v53 = vsub.f32 %v644_v45, %v647_v52 }
 0x2df   :  { %v649_v54 = vmul.f32 1.442695, %v648_v53 }
 0x2e1   :  { %2637 = vpow2.f32 %v649_v54 }
 0x2ee   :  { %v2638_v55 = vpop.eup %2637 }
 0x2ef   :  { %v651_v56 = vsel %vm401_vm2, %v2638_v55, 0.0 }
 0x2f0   :  { %652 = vadd.xlane.f32.xlu1 %v651_v56 }
 0x301   :  { %657 = vrot.lane.b32.xlu1 %v2954_v33, %s2827_s15 }
 0x305   :  { %v488_v57 = vpop.xlane.xlu0 %487  ;;  %882 = vrot.lane.b32.xlu1 %v2934_v26, %s2828_s5 }
 0x306   :  { %2639 = vrcp.f32 %v488_v57 }
 0x309   :  { %880 = vrot.lane.b32.xlu1 %v2936_v28, %s2828_s5  ;;  %v972_v3 = vpop.permute.xlu0 %971 }
 0x313   :  { %v2640_v58 = vpop.eup %2639 }
 0x314   :  { %v490_v59 = vmul.f32 %v2640_v58, %v2636_v50 }
 0x316   :  { %2509 = vmatmul.mubr.msk.f32.vlgmr.msra.gmra.mxu1 %vm401_vm2, %v490_v59  ;;  %v3064_v59 = vld [vmem:[#allocation8 + $0x8] sm:$0xff] }
 0x317   :  { %2518 = vmatprep.mubr.msk.f32.mxu1 %vm2826_vm1, %v2825_v12 }
 0x379   :  { %v653_v61 = vpop.xlane.xlu1 %652 }
 0x37a   :  { %2641 = vrcp.f32 %v653_v61 }
 0x37d   :  { %v658_v62 = vpop.permute.xlu1 %657 }
 0x37e   :  { %2517 = vmatpush3.msra.mxu1 %v658_v62 }
 0x37f   :  { %2526 = vmatprep.subr.mxu1 %v2825_v12 }
 0x381   :  { %v883_v5 = vpop.permute.xlu1 %882 }
 0x385   :  { %v881_v8 = vpop.permute.xlu1 %880 }
 0x387   :  { %v2642_v63 = vpop.eup %2641 }
 0x388   :  { %v655_v0 = vmul.f32 %v2642_v63, %v2638_v55 }
 0x38a   :  { %2519 = vmatmul.mubr.msk.f32.vlgmr.msra.gmra.mxu1 %vm401_vm2, %v655_v0 }
 0x38b   :  { %2527 = vmatpush3.msra.mxu1 %v2987_v1  ;;  %2528 = vmatprep.mubr.msk.f32.mxu1 %vm2826_vm1, %v2825_v12 }
 0x38c   :  { %2536 = vmatprep.subr.mxu1 %v2825_v12 }
 0x3d6   :  { %v560_v2 = vpop.f32.mrf.mxu1 }
 0x3d7   :  { %2529 = vmatmul.mubr.msk.f32.vlgmr.msra.gmra.mxu1 %vm401_vm2, %v560_v2 }
 0x3d8   :  { %2537 = vmatpush3.msra.mxu1 %v972_v3  ;;  %v2510_v4 = vpop.f32.mrf.mxu1  ;;  %2538 = vmatprep.mubr.msk.f32.mxu1 %vm2826_vm1, %v2825_v12 }
 0x3d9   :  { %2546 = vmatprep.subr.mxu1 %v2825_v12 }
 0x44a   :  { %v729_v6 = vpop.f32.mrf.mxu1 }
 0x44b   :  { %2524 = vmatmul.mubr.msk.f32.vlgmr.msra.gmra.mxu0 %vm401_vm2, %v729_v6 }
 0x44c   :  { %2532 = vmatpush3.xpose.msk.msra.mxu0 %vm401_vm2, %v883_v5  ;;  %v2520_v7 = vpop.f32.mrf.mxu1  ;;  %2533 = vmatprep.mubr.msk.f32.mxu0 %vm2826_vm1, %v2825_v12 }
 0x44d   :  { %2541 = vmatprep.subr.mxu0 %v2825_v12 }
 0x44f   :  { %2534 = vmatmul.mubr.msk.f32.vlgmr.msra.gmra.mxu0 %vm401_vm2, %v881_v8 }
 0x450   :  { %2543 = vmatprep.mubr.msk.f32.mxu0 %vm2826_vm1, %v2825_v12  ;;  %2542 = vmatpush3.msra.mxu0 %v3017_v27 }
 0x451   :  { %2551 = vmatprep.subr.mxu0 %v2825_v12 }
 0x497   :  { %v876_v9 = vpop.f32.mrf.mxu1 }
 0x499   :  { %v2530_v10 = vpop.f32.mrf.mxu1 }
 0x50b   :  { %v803_v11 = vpop.f32.mrf.mxu0 }
 0x50c   :  { %v877_v47 = vadd.f32 %v876_v9, %v803_v11 }
 0x50d   :  { %v2525_v13 = vpop.f32.mrf.mxu0 }
 0x50f   :  { %v954_v14 = vpop.f32.mrf.mxu0 }
 0x510   :  { %v958_v15 = vmul.f32 0.35355338, %v954_v14 }
 0x511   :  { %v2535_v16 = vpop.f32.mrf.mxu0 }
 0x512   :  { %v959_v17 = vadd.f32 %v958_v15, %v2963_v37 }
 0x514   :  { %v960_v18 = vsel %vm401_vm2, %v959_v17, -inf }
 0x515   :  { %961 = vmax.xlane.f32.xlu1 %v960_v18 }
 0x526   :  { %1213 = vrot.lane.b32.xlu1 %v2954_v33, %s2829_s18 }
 0x52a   :  { %1539 = vrot.lane.b32.xlu1 %v2930_v22, %s2827_s15 }
 0x59e   :  { %v962_v19 = vpop.xlane.xlu1 %961 }
 0x59f   :  { %v963_v20 = vsub.f32 %v959_v17, %v962_v19  ;;  %v3079_v17 = vld [vmem:[%s3151_s7] ss:$0 sm:$0xff]  ;;  %s2830_s7 = smov [#allocation13]  }
 0x5a0   :  { %s2343_s1 = sshll.u32 %s2830_s7, 4  ;;  %s2344_s1 = int_to_ptr.vmem [resolvable:$true] %s2343_s1 }
 0x5a1   :  { %v964_v21 = vmul.f32 1.442695, %v963_v20  ;;  %s2787_s21 = scalar_lea.vmem %s2344_s1, 256  ;;  %p2792_p3 = scmp.lt.s32.totalorder %s2344_s1, %s2344_s1 }
 0x5a2   :  { %v1214_v34 = vpop.permute.xlu1 %1213  ;;  %p2788_p2 = scmp.ne.s32.totalorder %s2344_s1, %s2787_s21  ;;  %p2793_p4 = scmp.lt.s32.totalorder %s2787_s21, %s2787_s21 }
 0x5a3   :  { %2643 = vpow2.f32 %v964_v21 }
 0x5a4   :  { %p2794_p5 = por %p2793_p4, %p2792_p3 }
 0x5a6   :  { %p2795_p6 = pnand %p2794_p5, %p2788_p2 }
 0x5b0   :  { %v2644_v23 = vpop.eup %2643 }
 0x5b1   :  { %v966_v24 = vsel %vm401_vm2, %v2644_v23, 0.0 }
 0x5b2   :  { %967 = vadd.xlane.f32.xlu0 %v966_v24 }
 0x5c8   :  { %1124 = vrot.lane.b32.xlu0 %v2934_v26, %s2829_s18 }
 0x5cc   :  { %1122 = vrot.lane.b32.xlu0 %v2936_v28, %s2829_s18 }
 0x63b   :  { %v968_v29 = vpop.xlane.xlu0 %967 }
 0x63c   :  { %2645 = vrcp.f32 %v968_v29 }
 0x63f   :  { %v1125_v32 = vpop.permute.xlu0 %1124 }
 0x643   :  { %v1123_v26 = vpop.permute.xlu0 %1122 }
 0x649   :  { %v2646_v30 = vpop.eup %2645 }
 0x64a   :  { %v970_v33 = vmul.f32 %v2646_v30, %v2644_v23 }
 0x64c   :  { %2539 = vmatmul.mubr.msk.f32.vlgmr.msra.gmra.mxu1 %vm401_vm2, %v970_v33 }
 0x64d   :  { %2547 = vmatpush3.xpose.msk.msra.mxu1 %vm401_vm2, %v1125_v32  ;;  %2548 = vmatprep.mubr.msk.f32.mxu1 %vm2826_vm1, %v2825_v12 }
 0x64e   :  { %2556 = vmatprep.subr.mxu1 %v2825_v12 }
 0x650   :  { %2549 = vmatmul.mubr.msk.f32.vlgmr.msra.gmra.mxu1 %vm401_vm2, %v1123_v26 }
 0x651   :  { %2558 = vmatprep.mubr.msk.f32.mxu1 %vm2826_vm1, %v2825_v12  ;;  %2557 = vmatpush3.msra.mxu1 %v3038_v51 }
 0x652   :  { %2566 = vmatprep.subr.mxu1 %v2825_v12 }
 0x70c   :  { %v1043_v28 = vpop.f32.mrf.mxu1 }
 0x70d   :  { %2544 = vmatmul.mubr.msk.f32.vlgmr.msra.gmra.mxu0 %vm401_vm2, %v1043_v28 }
 0x70e   :  { %2552 = vmatpush3.msra.mxu0 %v1214_v34  ;;  %v2540_v35 = vpop.f32.mrf.mxu1  ;;  %2553 = vmatprep.mubr.msk.f32.mxu0 %vm2826_vm1, %v2825_v12 }
 0x70f   :  { %2561 = vmatprep.subr.mxu0 %v2825_v12 }
 0x710   :  { %v1196_v36 = vpop.f32.mrf.mxu1 }
 0x711   :  { %v1200_v38 = vmul.f32 0.35355338, %v1196_v36 }
 0x712   :  { %v2550_v39 = vpop.f32.mrf.mxu1 }
 0x713   :  { %v1201_v40 = vadd.f32 %v1200_v38, %v2963_v37  ;;  %v1540_v37 = vpop.permute.xlu1 %1539 }
 0x715   :  { %v1202_v41 = vsel %vm401_vm2, %v1201_v40, -inf }
 0x716   :  { %1203 = vmax.xlane.f32.xlu0 %v1202_v41 }
 0x79f   :  { %v1204_v42 = vpop.xlane.xlu0 %1203 }
 0x7a0   :  { %v1205_v43 = vsub.f32 %v1201_v40, %v1204_v42 }
 0x7a2   :  { %v1206_v44 = vmul.f32 1.442695, %v1205_v43 }
 0x7a4   :  { %2647 = vpow2.f32 %v1206_v44 }
 0x7b1   :  { %v2648_v45 = vpop.eup %2647 }
 0x7b2   :  { %v1208_v46 = vsel %vm401_vm2, %v2648_v45, 0.0 }
 0x7b3   :  { %1209 = vadd.xlane.f32.xlu1 %v1208_v46 }
 0x7c4   :  { %1537 = vrot.lane.b32.xlu1 %v2932_v25, %s2827_s15 }
 0x7cd   :  { %v1117_v48 = vpop.f32.mrf.mxu0 }
 0x7ce   :  { %v1121_v49 = vadd.f32 %v1117_v48, %v877_v47 }
 0x7cf   :  { %v2545_v50 = vpop.f32.mrf.mxu0 }
 0x83c   :  { %v1210_v52 = vpop.xlane.xlu1 %1209 }
 0x83d   :  { %2649 = vrcp.f32 %v1210_v52 }
 0x840   :  { %v1538_v55 = vpop.permute.xlu1 %1537 }
 0x84a   :  { %v2650_v53 = vpop.eup %2649 }
 0x84b   :  { %v1212_v54 = vmul.f32 %v2650_v53, %v2648_v45 }
 0x84d   :  { %2554 = vmatmul.mubr.msk.f32.vlgmr.msra.gmra.mxu0 %vm401_vm2, %v1212_v54 }
 0x84e   :  { %2562 = vmatpush3.xpose.msk.msra.mxu0 %vm401_vm2, %v2930_v22  ;;  %2563 = vmatprep.mubr.msk.f32.mxu0 %vm2826_vm1, %v2825_v12 }
 0x84f   :  { %2571 = vmatprep.subr.mxu0 %v2825_v12 }
 0x851   :  { %2564 = vmatmul.mubr.msk.f32.vlgmr.msra.gmra.mxu0 %vm401_vm2, %v2932_v25 }
 0x852   :  { %2572 = vmatpush3.xpose.msk.msra.mxu0 %vm401_vm2, %v1540_v37  ;;  %2573 = vmatprep.mubr.msk.f32.mxu0 %vm2826_vm1, %v2825_v12 }
 0x853   :  { %2581 = vmatprep.subr.mxu0 %v2825_v12 }
 0x855   :  { %2574 = vmatmul.mubr.msk.f32.vlgmr.msra.gmra.mxu0 %vm401_vm2, %v1538_v55 }
 0x856   :  { %2582 = vmatpush3.msra.mxu0 %v2982_v60  ;;  %2583 = vmatprep.mubr.msk.f32.mxu0 %vm2826_vm1, %v2825_v12 }
 0x857   :  { %2591 = vmatprep.subr.mxu0 %v2825_v12 }
 0x90d   :  { %v1285_v56 = vpop.f32.mrf.mxu0 }
 0x90e   :  { %2559 = vmatmul.mubr.msk.f32.vlgmr.msra.gmra.mxu1 %vm401_vm2, %v1285_v56 }
 0x90f   :  { %2567 = vmatpush3.msra.mxu1 %v2952_v31  ;;  %v2555_v57 = vpop.f32.mrf.mxu0  ;;  %2568 = vmatprep.mubr.msk.f32.mxu1 %vm2826_vm1, %v2825_v12 }
 0x910   :  { %2576 = vmatprep.subr.mxu1 %v2825_v12 }
 0x911   :  { %v1446_v58 = vpop.f32.mrf.mxu0 }
 0x912   :  { %v1450_v60 = vmul.f32 0.35355338, %v1446_v58 }
 0x913   :  { %v2565_v61 = vpop.f32.mrf.mxu0 }
 0x914   :  { %v1451_v62 = vadd.f32 %v1450_v60, %v3064_v59 }
 0x915   :  { %v1611_v63 = vpop.f32.mrf.mxu0 }
 0x916   :  { %v1615_v0 = vmul.f32 0.35355338, %v1611_v63  ;;  %v1452_v2 = vsel %vm401_vm2, %v1451_v62, -inf }
 0x917   :  { %1453 = vmax.xlane.f32.xlu1 %v1452_v2  ;;  %v2575_v3 = vpop.f32.mrf.mxu0 }
 0x918   :  { %v1616_v4 = vadd.f32 %v1615_v0, %v3064_v59 }
 0x91a   :  { %v1617_v5 = vsel %vm401_vm2, %v1616_v4, -inf }
 0x91b   :  { %1618 = vmax.xlane.f32.xlu0 %v1617_v5 }
 0x928   :  { %1852 = vrot.lane.b32.xlu1 %v2932_v25, %s2828_s5 }
 0x9a0   :  { %v1454_v6 = vpop.xlane.xlu1 %1453 }
 0x9a1   :  { %v1455_v7 = vsub.f32 %v1451_v62, %v1454_v6 }
 0x9a3   :  { %v1456_v8 = vmul.f32 1.442695, %v1455_v7 }
 0x9a4   :  { %v1619_v9 = vpop.xlane.xlu0 %1618 }
 0x9a5   :  { %2651 = vpow2.f32 %v1456_v8  ;;  %v1620_v10 = vsub.f32 %v1616_v4, %v1619_v9 }
 0x9a7   :  { %v1621_v11 = vmul.f32 1.442695, %v1620_v10 }
 0x9a9   :  { %2653 = vpow2.f32 %v1621_v11 }
 0x9b2   :  { %v2652_v13 = vpop.eup %2651 }
 0x9b3   :  { %v1458_v14 = vsel %vm401_vm2, %v2652_v13, 0.0 }
 0x9b4   :  { %1459 = vadd.xlane.f32.xlu0 %v1458_v14 }
 0x9b6   :  { %v2654_v15 = vpop.eup %2653 }
 0x9b7   :  { %v1623_v16 = vsel %vm401_vm2, %v2654_v15, 0.0 }
 0x9b8   :  { %1624 = vadd.xlane.f32.xlu0 %v1623_v16 }
 0x9ce   :  { %1629 = vrot.lane.b32.xlu0 %v2952_v31, %s2827_s15  ;;  %v1359_v18 = vpop.f32.mrf.mxu1 }
 0x9cf   :  { %v1363_v19 = vadd.f32 %v1359_v18, %v1121_v49 }
 0x9d0   :  { %v2560_v20 = vpop.f32.mrf.mxu1 }
 0x9d1   :  { %v1370_v21 = vadd.f32 %v3079_v17, %v1363_v19 }
 0x9d2   :  { %1854 = vrot.lane.b32.xlu0 %v2930_v22, %s2828_s5 }
 0x9d3   :  { %1371 = vst.msk [vmem:[#allocation13] sm:$0xff] %vm125_vm0, %v1370_v21 }
 0xa3d   :  { %v1460_v23 = vpop.xlane.xlu0 %1459 }
 0xa3e   :  { %2655 = vrcp.f32 %v1460_v23 }
 0xa41   :  { %v1625_v24 = vpop.xlane.xlu0 %1624 }
 0xa42   :  { %2657 = vrcp.f32 %v1625_v24 }
 0xa45   :  { %v1630_v32 = vpop.permute.xlu0 %1629 }
 0xa49   :  { %v1855_v36 = vpop.permute.xlu0 %1854 }
 0xa4b   :  { %v2656_v29 = vpop.eup %2655 }
 0xa4c   :  { %v1462_v30 = vmul.f32 %v2656_v29, %v2652_v13 }
 0xa4e   :  { %2569 = vmatmul.mubr.msk.f32.vlgmr.msra.gmra.mxu1 %vm401_vm2, %v1462_v30 }
 0xa4f   :  { %v2658_v33 = vpop.eup %2657  ;;  %2577 = vmatpush3.msra.mxu1 %v1630_v32  ;;  %2578 = vmatprep.mubr.msk.f32.mxu1 %vm2826_vm1, %v2825_v12 }
 0xa50   :  { %v1627_v26 = vmul.f32 %v2658_v33, %v2654_v15  ;;  %2586 = vmatprep.subr.mxu1 %v2825_v12 }
 0xa52   :  { %2579 = vmatmul.mubr.msk.f32.vlgmr.msra.gmra.mxu1 %vm401_vm2, %v1627_v26 }
 0xa53   :  { %2587 = vmatpush3.msra.mxu1 %v2987_v1  ;;  %2588 = vmatprep.mubr.msk.f32.mxu1 %vm2826_vm1, %v2825_v12  ;;  %v1853_v1 = vpop.permute.xlu1 %1852 }
 0xa54   :  { %2596 = vmatprep.subr.mxu1 %v2825_v12 }
 0xb0e   :  { %v1532_v28 = vpop.f32.mrf.mxu1 }
 0xb0f   :  { %2589 = vmatmul.mubr.msk.f32.vlgmr.msra.gmra.mxu1 %vm401_vm2, %v1532_v28 }
 0xb10   :  { %v2570_v34 = vpop.f32.mrf.mxu1  ;;  %2598 = vmatprep.mubr.msk.f32.mxu1 %vm2826_vm1, %v2825_v12 }
 0xb12   :  { %v1701_v35 = vpop.f32.mrf.mxu1 }
 0xb13   :  { %2584 = vmatmul.mubr.msk.f32.vlgmr.msra.gmra.mxu0 %vm401_vm2, %v1701_v35 }
 0xb14   :  { %2592 = vmatpush3.xpose.msk.msra.mxu0 %vm401_vm2, %v1855_v36  ;;  %v2580_v38 = vpop.f32.mrf.mxu1  ;;  %2593 = vmatprep.mubr.msk.f32.mxu0 %vm2826_vm1, %v2825_v12 }
 0xb15   :  { %2601 = vmatprep.subr.mxu0 %v2825_v12 }
 0xb17   :  { %2594 = vmatmul.mubr.msk.f32.vlgmr.msra.gmra.mxu0 %vm401_vm2, %v1853_v1 }
 0xb18   :  { %2602 = vmatpush3.msra.mxu0 %v3017_v27  ;;  %2603 = vmatprep.mubr.msk.f32.mxu0 %vm2826_vm1, %v2825_v12 }
 0xb19   :  { %2611 = vmatprep.subr.mxu0 %v2825_v12 }
 0xbcf   :  { %v1848_v39 = vpop.f32.mrf.mxu1 }
 0xbd1   :  { %v2590_v40 = vpop.f32.mrf.mxu1 }
 0xbd3   :  { %v1775_v41 = vpop.f32.mrf.mxu0 }
 0xbd4   :  { %v1849_v42 = vadd.f32 %v1848_v39, %v1775_v41 }
 0xbd5   :  { %v2585_v43 = vpop.f32.mrf.mxu0 }
 0xbd7   :  { %v1926_v44 = vpop.f32.mrf.mxu0 }
 0xbd8   :  { %v1930_v45 = vmul.f32 0.35355338, %v1926_v44 }
 0xbd9   :  { %v2595_v46 = vpop.f32.mrf.mxu0 }
 0xbda   :  { %v1931_v47 = vadd.f32 %v1930_v45, %v3064_v59 }
 0xbdc   :  { %v1932_v48 = vsel %vm401_vm2, %v1931_v47, -inf }
 0xbdd   :  { %1933 = vmax.xlane.f32.xlu0 %v1932_v48 }
 0xbf3   :  { %1943 = vrot.lane.b32.xlu0 %v2952_v31, %s2828_s5 }
 0xbf7   :  { %2094 = vrot.lane.b32.xlu0 %v2932_v25, %s2829_s18 }
 0xc66   :  { %v1934_v27 = vpop.xlane.xlu0 %1933 }
 0xc67   :  { %v1935_v49 = vsub.f32 %v1931_v47, %v1934_v27 }
 0xc69   :  { %v1936_v50 = vmul.f32 1.442695, %v1935_v49 }
 0xc6a   :  { %v1944_v37 = vpop.permute.xlu0 %1943 }
 0xc6b   :  { %2659 = vpow2.f32 %v1936_v50  ;;  %2597 = vmatpush3.msra.mxu1 %v1944_v37 }
 0xc6c   :  { %2606 = vmatprep.subr.mxu1 %v2825_v12 }
 0xc6e   :  { %v2095_v57 = vpop.permute.xlu0 %2094 }
 0xc78   :  { %v2660_v52 = vpop.eup %2659 }
 0xc79   :  { %v1938_v53 = vsel %vm401_vm2, %v2660_v52, 0.0 }
 0xc7a   :  { %1939 = vadd.xlane.f32.xlu1 %v1938_v53 }
 0xc8b   :  { %2096 = vrot.lane.b32.xlu1 %v2930_v22, %s2829_s18 }
 0xd03   :  { %v1940_v54 = vpop.xlane.xlu1 %1939 }
 0xd04   :  { %2661 = vrcp.f32 %v1940_v54 }
 0xd07   :  { %v2097_v25 = vpop.permute.xlu1 %2096 }
 0xd11   :  { %v2662_v55 = vpop.eup %2661 }
 0xd12   :  { %v1942_v56 = vmul.f32 %v2662_v55, %v2660_v52 }
 0xd14   :  { %2599 = vmatmul.mubr.msk.f32.vlgmr.msra.gmra.mxu1 %vm401_vm2, %v1942_v56 }
 0xd15   :  { %2607 = vmatpush3.xpose.msk.msra.mxu1 %vm401_vm2, %v2097_v25  ;;  %2608 = vmatprep.mubr.msk.f32.mxu1 %vm2826_vm1, %v2825_v12 }
 0xd16   :  { %2616 = vmatprep.subr.mxu1 %v2825_v12 }
 0xd18   :  { %2609 = vmatmul.mubr.msk.f32.vlgmr.msra.gmra.mxu1 %vm401_vm2, %v2095_v57 }
 0xd19   :  { %2617 = vmatpush3.msra.mxu1 %v3038_v51  ;;  %2618 = vmatprep.mubr.msk.f32.mxu1 %vm2826_vm1, %v2825_v12 }
 0xdd4   :  { %v2015_v22 = vpop.f32.mrf.mxu1 }
 0xdd5   :  { %2604 = vmatmul.mubr.msk.f32.vlgmr.msra.gmra.mxu0 %vm401_vm2, %v2015_v22 }
 0xdd6   :  { %v2600_v58 = vpop.f32.mrf.mxu1  ;;  %2613 = vmatprep.mubr.msk.f32.mxu0 %vm2826_vm1, %v2825_v12 }
 0xdd8   :  { %v2168_v60 = vpop.f32.mrf.mxu1 }
 0xdd9   :  { %v2172_v61 = vmul.f32 0.35355338, %v2168_v60 }
 0xdda   :  { %v2610_v62 = vpop.f32.mrf.mxu1 }
 0xddb   :  { %v2173_v63 = vadd.f32 %v2172_v61, %v3064_v59 }
 0xddd   :  { %v2174_v0 = vsel %vm401_vm2, %v2173_v63, -inf }
 0xdde   :  { %2175 = vmax.xlane.f32.xlu0 %v2174_v0 }
 0xdf4   :  { %2185 = vrot.lane.b32.xlu0 %v2952_v31, %s2829_s18 }
 0xe67   :  { %v2176_v51 = vpop.xlane.xlu0 %2175 }
 0xe68   :  { %v2177_v2 = vsub.f32 %v2173_v63, %v2176_v51 }
 0xe6a   :  { %v2178_v3 = vmul.f32 1.442695, %v2177_v2 }
 0xe6b   :  { %v2186_v4 = vpop.permute.xlu0 %2185 }
 0xe6c   :  { %2663 = vpow2.f32 %v2178_v3  ;;  %2612 = vmatpush3.msra.mxu0 %v2186_v4 }
 0xe79   :  { %v2664_v5 = vpop.eup %2663 }
 0xe7a   :  { %v2180_v12 = vsel %vm401_vm2, %v2664_v5, 0.0 }
 0xe7b   :  { %2181 = vadd.xlane.f32.xlu1 %v2180_v12 }
 0xe95   :  { %v2089_v6 = vpop.f32.mrf.mxu0 }
 0xe96   :  { %v2093_v7 = vadd.f32 %v2089_v6, %v1849_v42 }
 0xe97   :  { %v2605_v8 = vpop.f32.mrf.mxu0 }
 0xf04   :  { %v2182_v59 = vpop.xlane.xlu1 %2181 }
 0xf05   :  { %2665 = vrcp.f32 %v2182_v59 }
 0xf12   :  { %v2666_v9 = vpop.eup %2665 }
 0xf13   :  { %v2184_v10 = vmul.f32 %v2666_v9, %v2664_v5 }
 0xf15   :  { %2614 = vmatmul.mubr.msk.f32.vlgmr.msra.gmra.mxu0 %vm401_vm2, %v2184_v10 }
 0xfd5   :  { %v2257_v31 = vpop.f32.mrf.mxu0 }
 0xfd6   :  { %2619 = vmatmul.mubr.msk.f32.vlgmr.msra.gmra.mxu1 %vm401_vm2, %v2257_v31 }
 0xfd7   :  { %v2615_v11 = vpop.f32.mrf.mxu0 }
0x1096   :  { %v2331_v13 = vpop.f32.mrf.mxu1 }
0x1097   :  { %v2335_v14 = vadd.f32 %v2331_v13, %v2093_v7 }
0x1098   :  { %v2620_v15 = vpop.f32.mrf.mxu1 }
0x1099   :  { %v2336_v16 = vadd.f32 %v3079_v17, %v2335_v14 }
0x109b   :  { %2337 = vst.msk [vmem:[#allocation13 + $0x8] sm:$0xff] %vm125_vm0, %v2336_v16 }
0x109c   :  { %2798 = shalt.err (!%p2795_p6)
}
0x109d   :  { %2349 = dma.vmem_to_hbm [thread:$0]  %s2344_s1, 256, %s3152_s8, [#allocation4], %s2819_s10, %s2819_s10, %s2820_s11  }
0x109e   :  { %2815 = dma.done.wait [#allocation4], 256  }
0x109f   :  { %2816 = vsyncadd [#allocation4], 4294967040 }
0x10a0   :  { %2353 = vsyncpa [#allocation3], 1 }
0x10a1   :  { %2354 = vsyncpa [#allocation6], 1 }
0x10a2   :  { %2355 = vsyncpa [#allocation9], 1 }
0x10a3   :  { %2356 = vsyncpa [#allocation12], 1 }
0x10a4   :  { %2357 = vsyncpa [#allocation4], 1 }

</bundles_post_ra>
